<compile_context>
chip_gen: v7x
topology: tpu7x:2x2x1
jax: 0.10.0
libtpu: 0.0.40
codegen_flags: <defaults>
</compile_context>

<pallas_src>
import numpy as np
import jax
import jax.numpy as jnp
from jax import lax
from jax.experimental import pallas as pl
from jax.experimental.pallas import tpu as pltpu


_VMEM_LIMIT = 48 * 1024 * 1024  # explicit scoped-VMEM cap; leaves headroom on v7x (64 MiB/TC)


def _pick_t_tile(T, max_tile=256):
    """Largest T tile that is a multiple of 128 and divides T (else the full T)."""
    if T <= max_tile or T % 128 != 0:
        return T
    for cand in range(max_tile, 0, -128):
        if T % cand == 0:
            return cand
    return T


# ----------------------------------------------------------------------------
# Kernel A: fused SigmoidMask head + complex mask multiply
#   per grid cell (b, m, t):
#     mask(2Fb, Tt) = sigmoid(W_m @ lstm_b[:, t-tile] + bias_m)
#     out(2Fb, Tt)  = complex_mul(mask, X[b, m % in_ch])
# ----------------------------------------------------------------------------
def _mask_cmul_kernel(lstm_ref, w_ref, b_ref, x_ref, o_ref):
    # lstm_ref: (C, Tt) bf16 | w_ref: (2Fb, C) bf16 | b_ref: (2Fb, 1) f32
    # x_ref   : (2Fb, Tt) f32 (rows [0:Fb] = re, [Fb:2Fb] = im) | o_ref: (2Fb, Tt) f32
    y = jnp.dot(w_ref[...], lstm_ref[...], preferred_element_type=jnp.float32)
    m = jax.nn.sigmoid(y + b_ref[...])                     # f32 sigmoid (EUP)
    fb = o_ref.shape[0] // 2
    m_re, m_im = m[:fb, :], m[fb:, :]
    b_re = x_ref[pl.ds(0, fb), :]
    b_im = x_ref[pl.ds(fb, fb), :]
    o_ref[pl.ds(0, fb), :] = m_re * b_re - m_im * b_im
    o_ref[pl.ds(fb, fb), :] = m_re * b_im + m_im * b_re


def mask_cmul(lstm_bf16, w3, b3, x4, *, in_channel):
    """lstm: (B,C,T) bf16, w3: (M,2Fb,C) bf16, b3: (M,2Fb,1) f32,
    x4: (B,IC,2Fb,T) f32  ->  masked (B,M,2Fb,T) f32."""
    B, C, T = lstm_bf16.shape
    M, two_fb, _ = w3.shape
    Tt = _pick_t_tile(T)
    nT = T // Tt

    if in_channel == 1:
        x_idx = lambda b, m, t: (b, 0, 0, t)
    else:
        x_idx = lambda b, m, t: (b, m % in_channel, 0, t)

    return pl.pallas_call(
        _mask_cmul_kernel,
        out_shape=jax.ShapeDtypeStruct((B, M, two_fb, T), jnp.float32),
        grid=(B, M, nT),
        in_specs=[
            pl.BlockSpec((None, C, Tt), lambda b, m, t: (b, 0, t)),
            pl.BlockSpec((None, two_fb, C), lambda b, m, t: (m, 0, 0)),
            pl.BlockSpec((None, two_fb, 1), lambda b, m, t: (m, 0, 0)),
            pl.BlockSpec((None, None, two_fb, Tt), x_idx),
        ],
        out_specs=pl.BlockSpec((None, None, two_fb, Tt),
                               lambda b, m, t: (b, m, 0, t)),
        compiler_params=pltpu.CompilerParams(
            dimension_semantics=("parallel", "parallel", "parallel"),
            vmem_limit_bytes=_VMEM_LIMIT),
    )(lstm_bf16, w3, b3, x4)


# ----------------------------------------------------------------------------
# Kernel B: trainable ISTFT as per-frame matmul + in-kernel overlap-add
#   frames(T, n_fft) = spec(2Fb, T)^T @ W(2Fb, n_fft);   out rows = T + R - 1
#   (output viewed as (T + R - 1, hop) rows; frame t, chunk r lands at row t + r)
# ----------------------------------------------------------------------------
def _istft_ola_kernel(s_ref, w_ref, o_ref):
    # s_ref: (2Fb, T) f32 | w_ref: (2Fb, n_fft) bf16 | o_ref: (T+R-1, hop) f32
    frames = lax.dot_general(
        s_ref[...].astype(jnp.bfloat16), w_ref[...],
        dimension_numbers=(((0,), (0,)), ((), ())),
        preferred_element_type=jnp.float32)                # (T, n_fft)
    T = frames.shape[0]
    hop = o_ref.shape[1]
    R = frames.shape[1] // hop                              # n_fft // hop (small, typ. 4)
    o_ref[...] = jnp.zeros_like(o_ref)
    for r in range(R):                                      # unrolled overlap-add
        cur = o_ref[pl.ds(r, T), :]
        o_ref[pl.ds(r, T), :] = cur + frames[:, r * hop:(r + 1) * hop]


def istft_ola(spec, w_ist_bf16, *, n_fft, hop):
    """spec: (N, 2Fb, T) f32, w_ist: (2Fb, n_fft) bf16 -> (N, T + n_fft//hop - 1, hop)."""
    N, two_fb, T = spec.shape
    R = n_fft // hop
    rows = T + R - 1
    # TODO(synk): at very large T, also tile T here (resident output block across an
    # "arbitrary" frame axis); full-T blocks are kept for simplicity.
    return pl.pallas_call(
        _istft_ola_kernel,
        out_shape=jax.ShapeDtypeStruct((N, rows, hop), jnp.float32),
        grid=(N,),
        in_specs=[
            pl.BlockSpec((None, two_fb, T), lambda n: (n, 0, 0)),
            pl.BlockSpec((two_fb, n_fft), lambda n: (0, 0)),
        ],
        out_specs=pl.BlockSpec((None, rows, hop), lambda n: (n, 0, 0)),
        compiler_params=pltpu.CompilerParams(
            dimension_semantics=("parallel",),
            vmem_limit_bytes=_VMEM_LIMIT),
    )(spec, w_ist_bf16)


# ----------------------------------------------------------------------------
# Parameter setup (deterministic, in-script; ISTFT basis hoisted out of forward)
# ----------------------------------------------------------------------------
def build_istft_basis(n_fft):
    """Windowed inverse-DFT basis of TrainableISTFTLayer's ConvTranspose1d weight,
    shape (2*Fb, n_fft): rows [0:Fb] = cos (real), rows [Fb:2Fb] = -sin (imag)."""
    fb = n_fft // 2 + 1
    n = np.arange(n_fft)[None, :]
    f = np.arange(fb)[:, None]
    win = 0.5 - 0.5 * np.cos(2.0 * np.pi * np.arange(n_fft) / n_fft)  # hann
    scale = np.where((f == 0) | (f == n_fft // 2), 1.0, 2.0) / n_fft
    cos_b = np.cos(2.0 * np.pi * f * n / n_fft) * win[None, :] * scale
    sin_b = -np.sin(2.0 * np.pi * f * n / n_fft) * win[None, :] * scale
    return np.concatenate([cos_b, sin_b], axis=0).astype(np.float32)   # (2*Fb, n_fft)


def init_params(lstm_channel, n_fft, mask_num, key):
    fb = n_fft // 2 + 1
    two_fb = 2 * fb
    k_w, k_b = jax.random.split(key)
    bound = 1.0 / np.sqrt(lstm_channel)
    # 1x1 Conv1d weight stored as (mask_num, 2*Fb, C): rows within a mask are
    # [re_0..re_{Fb-1}, im_0..im_{Fb-1}] — same channel order as SigmoidMask.
    w = jax.random.uniform(k_w, (mask_num, two_fb, lstm_channel), jnp.float32, -bound, bound)
    b = jax.random.uniform(k_b, (mask_num, two_fb, 1), jnp.float32, -bound, bound)
    return {"mask_w": w, "mask_b": b, "istft_w": jnp.asarray(build_istft_basis(n_fft))}


# ----------------------------------------------------------------------------
# BaselineDecoder forward
# ----------------------------------------------------------------------------
def baseline_decoder_forward(params, lstm_out, X, *, in_channel, out_channel,
                             n_fft, hop_length=None, output_residual=False):
    hop = hop_length if hop_length else n_fft // 4
    assert n_fft % hop == 0, "hop must divide n_fft"  # TODO(synk): general hop needs per-frame OLA loop
    B, C_lstm, T = lstm_out.shape
    _, in_ch, two, Fb, Tx = X.shape
    assert in_ch == in_channel and two == 2 and Tx == T and Fb == n_fft // 2 + 1
    two_fb = 2 * Fb

    out_eff = out_channel - 1 if output_residual else out_channel
    mask_num = in_channel * out_eff

    # bf16 MXU operands (f32 accumulation inside the kernels)
    lstm_bf = lstm_out.astype(jnp.bfloat16)
    w3 = params["mask_w"].astype(jnp.bfloat16)           # (mask_num, 2Fb, C)
    b3 = params["mask_b"]                                # (mask_num, 2Fb, 1) f32
    w_ist = params["istft_w"].astype(jnp.bfloat16)       # (2Fb, n_fft)

    # (B, IC, 2, Fb, T) -> (B, IC, 2Fb, T): contiguous merge, rows [0:Fb]=re, [Fb:]=im
    X4 = X.reshape(B, in_channel, two_fb, T)

    # --- fused mask head (1x1 conv + sigmoid) + complex masking -------------
    masked = mask_cmul(lstm_bf, w3, b3, X4, in_channel=in_channel)   # (B, mask_num, 2Fb, T) f32
    masked = masked.reshape(B, out_eff, in_channel, two_fb, T)

    if output_residual:
        # spectral-domain residual, exactly as the reference module
        other = X4 - jnp.sum(masked, axis=1)                         # (B, IC, 2Fb, T)
        masked = jnp.concatenate([masked, other[:, None]], axis=1)   # (B, out_channel, IC, 2Fb, T)
    out_total = masked.shape[1]

    # --- trainable ISTFT: per-frame matmul + overlap-add ---------------------
    spec = masked.reshape(B * out_total * in_channel, two_fb, T)
    y = istft_ola(spec, w_ist, n_fft=n_fft, hop=hop)                 # (N, T+R-1, hop)
    L = (T - 1) * hop + n_fft
    # TODO(synk): the reference TrainableISTFTLayer may crop n_fft//2 edge samples;
    # the raw ConvTranspose1d output length is kept here.
    signals = y.reshape(B, out_total, in_channel, 1, L)

    # torch .squeeze(-3).squeeze(-2) semantics (only drop size-1 dims)
    if signals.shape[-3] == 1:
        signals = jnp.squeeze(signals, axis=-3)
    if signals.shape[-2] == 1:
        signals = jnp.squeeze(signals, axis=-2)
    return signals


# ----------------------------------------------------------------------------
if __name__ == "__main__":
    # Small config consistent with the module
    in_channel = 1
    out_channel = 2
    lstm_channel = 32
    n_fft = 16
    hop = n_fft // 4
    B, T = 2, 8
    Fb = n_fft // 2 + 1

    key = jax.random.PRNGKey(0)
    k_lstm, k_x, k_params = jax.random.split(key, 3)
    lstm_out = jax.random.normal(k_lstm, (B, lstm_channel, T), jnp.float32)
    X = jax.random.normal(k_x, (B, in_channel, 2, Fb, T), jnp.float32)

    params = init_params(lstm_channel, n_fft,
                         mask_num=in_channel * out_channel, key=k_params)

    signals = baseline_decoder_forward(
        params, lstm_out, X,
        in_channel=in_channel, out_channel=out_channel,
        n_fft=n_fft, hop_length=hop, output_residual=False)
    signals = jax.block_until_ready(signals)

    expected_len = (T - 1) * hop + n_fft
    assert signals.shape == (B, out_channel, expected_len), signals.shape
    assert bool(jnp.all(jnp.isfinite(signals)))
    print("KERNEL_OK")
</pallas_src>

<mosaic_0001>
module attributes {stable_mosaic.version = 11 : i64} {
  func.func @_mask_cmul_kernel(%arg0: i32, %arg1: i32, %arg2: i32, %arg3: memref<1x32x8xbf16, #tpu.memory_space<vmem>>, %arg4: memref<1x18x32xbf16, #tpu.memory_space<vmem>>, %arg5: memref<1x18x1xf32, #tpu.memory_space<vmem>>, %arg6: memref<1x1x18x8xf32, #tpu.memory_space<vmem>>, %arg7: memref<1x1x18x8xf32, #tpu.memory_space<vmem>>) attributes {dimension_semantics = [#tpu.dimension_semantics<parallel>, #tpu.dimension_semantics<parallel>, #tpu.dimension_semantics<parallel>], iteration_bounds = array<i64: 2, 2, 1>, scalar_prefetch = 0 : i64, scratch_operands = 0 : i64, tpu.core_type = #tpu.core_type<tc>, window_params = [{transform_indices = @transform_0, window_bounds = array<i64: 1, 32, 8>}, {transform_indices = @transform_1, window_bounds = array<i64: 1, 18, 32>}, {transform_indices = @transform_2, window_bounds = array<i64: 1, 18, 1>}, {transform_indices = @transform_3, window_bounds = array<i64: 1, 1, 18, 8>}, {transform_indices = @transform_4, window_bounds = array<i64: 1, 1, 18, 8>}]} {
    %c0 = arith.constant 0 : index
    %c0_0 = arith.constant 0 : index
    %c0_1 = arith.constant 0 : index
    %0 = vector.load %arg4[%c0, %c0_0, %c0_1] : memref<1x18x32xbf16, #tpu.memory_space<vmem>>, vector<1x18x32xbf16>
    %1 = vector.shape_cast %0 : vector<1x18x32xbf16> to vector<18x32xbf16>
    %c0_2 = arith.constant 0 : index
    %c0_3 = arith.constant 0 : index
    %c0_4 = arith.constant 0 : index
    %2 = vector.load %arg3[%c0_2, %c0_3, %c0_4] : memref<1x32x8xbf16, #tpu.memory_space<vmem>>, vector<1x32x8xbf16>
    %3 = vector.shape_cast %2 : vector<1x32x8xbf16> to vector<32x8xbf16>
    %cst = arith.constant dense<0.000000e+00> : vector<18x8xf32>
    %4 = tpu.matmul %1, %3, %cst {dimension_numbers = #tpu.dot_dimension_numbers<[1], [0], [0], [1], [0, 0, 1, 1], [], []>} : vector<18x32xbf16>, vector<32x8xbf16>, vector<18x8xf32> -> vector<18x8xf32>
    %c0_5 = arith.constant 0 : index
    %c0_6 = arith.constant 0 : index
    %c0_7 = arith.constant 0 : index
    %5 = vector.load %arg5[%c0_5, %c0_6, %c0_7] : memref<1x18x1xf32, #tpu.memory_space<vmem>>, vector<1x18x1xf32>
    %6 = vector.shape_cast %5 : vector<1x18x1xf32> to vector<18x1xf32>
    %7 = vector.broadcast %6 : vector<18x1xf32> to vector<18x8xf32>
    %8 = arith.addf %4, %7 : vector<18x8xf32>
    %9 = arith.negf %8 : vector<18x8xf32>
    %10 = math.exp %9 : vector<18x8xf32>
    %cst_8 = arith.constant 1.000000e+00 : f32
    %11 = vector.broadcast %cst_8 : f32 to vector<18x8xf32>
    %12 = arith.addf %11, %10 : vector<18x8xf32>
    %13 = arith.divf %11, %12 : vector<18x8xf32>
    %14 = vector.extract_strided_slice %13 {offsets = [0, 0], sizes = [9, 8], strides = [1, 1]} : vector<18x8xf32> to vector<9x8xf32>
    %15 = vector.extract_strided_slice %13 {offsets = [9, 0], sizes = [9, 8], strides = [1, 1]} : vector<18x8xf32> to vector<9x8xf32>
    %c0_9 = arith.constant 0 : index
    %c0_10 = arith.constant 0 : index
    %c0_11 = arith.constant 0 : index
    %c0_12 = arith.constant 0 : index
    %16 = vector.load %arg6[%c0_9, %c0_10, %c0_11, %c0_12] : memref<1x1x18x8xf32, #tpu.memory_space<vmem>>, vector<1x1x9x8xf32>
    %17 = vector.shape_cast %16 : vector<1x1x9x8xf32> to vector<9x8xf32>
    %c0_13 = arith.constant 0 : index
    %c0_14 = arith.constant 0 : index
    %c9 = arith.constant 9 : index
    %c0_15 = arith.constant 0 : index
    %18 = vector.load %arg6[%c0_13, %c0_14, %c9, %c0_15] : memref<1x1x18x8xf32, #tpu.memory_space<vmem>>, vector<1x1x9x8xf32>
    %19 = vector.shape_cast %18 : vector<1x1x9x8xf32> to vector<9x8xf32>
    %20 = arith.mulf %14, %17 : vector<9x8xf32>
    %21 = arith.mulf %15, %19 : vector<9x8xf32>
    %22 = arith.subf %20, %21 : vector<9x8xf32>
    %c0_16 = arith.constant 0 : index
    %c0_17 = arith.constant 0 : index
    %c0_18 = arith.constant 0 : index
    %c0_19 = arith.constant 0 : index
    %23 = vector.load %arg7[%c0_16, %c0_17, %c0_18, %c0_19] : memref<1x1x18x8xf32, #tpu.memory_space<vmem>>, vector<1x1x9x8xf32>
    %24 = vector.shape_cast %23 : vector<1x1x9x8xf32> to vector<9x8xf32>
    %25 = vector.shape_cast %22 : vector<9x8xf32> to vector<1x1x9x8xf32>
    tpu.vector_store %arg7[%c0_16, %c0_17, %c0_18, %c0_19], %25 {strides = array<i32>} : memref<1x1x18x8xf32, #tpu.memory_space<vmem>>, vector<1x1x9x8xf32>,
    %26 = arith.mulf %14, %19 : vector<9x8xf32>
    %27 = arith.mulf %15, %17 : vector<9x8xf32>
    %28 = arith.addf %26, %27 : vector<9x8xf32>
    %c0_20 = arith.constant 0 : index
    %c0_21 = arith.constant 0 : index
    %c9_22 = arith.constant 9 : index
    %c0_23 = arith.constant 0 : index
    %29 = vector.load %arg7[%c0_20, %c0_21, %c9_22, %c0_23] : memref<1x1x18x8xf32, #tpu.memory_space<vmem>>, vector<1x1x9x8xf32>
    %30 = vector.shape_cast %29 : vector<1x1x9x8xf32> to vector<9x8xf32>
    %31 = vector.shape_cast %28 : vector<9x8xf32> to vector<1x1x9x8xf32>
    tpu.vector_store %arg7[%c0_20, %c0_21, %c9_22, %c0_23], %31 {strides = array<i32>} : memref<1x1x18x8xf32, #tpu.memory_space<vmem>>, vector<1x1x9x8xf32>,
    return
  }
  func.func @transform_0(%arg0: i32, %arg1: i32, %arg2: i32) -> (i32, i32, i32) {
    %c0_i32 = arith.constant 0 : i32
    %c0_i32_0 = arith.constant 0 : i32
    return %arg0, %c0_i32, %arg2 : i32, i32, i32
  }
  func.func @transform_1(%arg0: i32, %arg1: i32, %arg2: i32) -> (i32, i32, i32) {
    %c0_i32 = arith.constant 0 : i32
    %c0_i32_0 = arith.constant 0 : i32
    %c0_i32_1 = arith.constant 0 : i32
    return %arg1, %c0_i32, %c0_i32_0 : i32, i32, i32
  }
  func.func @transform_2(%arg0: i32, %arg1: i32, %arg2: i32) -> (i32, i32, i32) {
    %c0_i32 = arith.constant 0 : i32
    %c0_i32_0 = arith.constant 0 : i32
    %c0_i32_1 = arith.constant 0 : i32
    return %arg1, %c0_i32, %c0_i32_0 : i32, i32, i32
  }
  func.func @transform_3(%arg0: i32, %arg1: i32, %arg2: i32) -> (i32, i32, i32, i32) {
    %c0_i32 = arith.constant 0 : i32
    %c0_i32_0 = arith.constant 0 : i32
    %c0_i32_1 = arith.constant 0 : i32
    return %arg0, %c0_i32, %c0_i32_0, %arg2 : i32, i32, i32, i32
  }
  func.func @transform_4(%arg0: i32, %arg1: i32, %arg2: i32) -> (i32, i32, i32, i32) {
    %c0_i32 = arith.constant 0 : i32
    %c0_i32_0 = arith.constant 0 : i32
    return %arg0, %arg1, %c0_i32, %arg2 : i32, i32, i32, i32
  }
}

</mosaic_0001>

<bundles_post_ra>
// kernel: tpu_custom_call.1
= control target key start
LH: loop header
LB: loop body
LE: loop exit
PB: predicated region body
PF: predicated region fallthrough
CT: control target
= control target key end

     0   :  { %s800_s15 = smov 0   ;;  %s802_s16 = smov 0   ;;  %s870_s0 = inlined_call_operand.vmem [shape: bf16[2,32,8], index: 0, kind: input, shape index: {}]   ;;  %s871_s1 = inlined_call_operand.vmem [shape: bf16[2,18,32], index: 1, kind: input, shape index: {}]   ;;  %s872_s2 = inlined_call_operand.vmem [shape: f32[2,18,1], index: 2, kind: input, shape index: {}]   ;;  %s873_s3 = inlined_call_operand.vmem [shape: f32[2,1,18,8], index: 3, kind: input, shape index: {}]   ;;  %s874_s4 = inlined_call_operand.vmem [shape: f32[2,2,18,8], index: 4, kind: output, shape index: {}]  }
   0x1   :  { %s804_s17 = smov 0   ;;  %s806_s18 = smov 0  }
   0x2   :  { %s808_s19 = smov 0  }
   0x3 LB: > { %s29_s20 = sadd.s32 1, %s764_s17  ;;  %s33_s21 = sadd.s32 1, %s768_s18  ;;  %s772_s19 = sphi %s808_s19, %s14_s19   ;;  %s768_s18 = sphi %s806_s18, %s878_s18   ;;  %s764_s17 = sphi %s804_s17, %s877_s17   ;;  %s760_s16 = sphi %s802_s16, %s876_s16   ;;  %s756_s15 = sphi %s800_s15, %s875_s15  }
   0x4   : > { %p31_p0 = scmp.ge.s32.totalorder %s29_s20, 2  ;;  %p639_p1 = scmp.ge.s32.totalorder %s772_s19, 1 }
   0x5   : > { %p225_p2 = scmp.lt.s32.totalorder %s772_s19, 5 }
   0x6   : > { %s880_s20 = smov (%p31_p0, %s29_s20), 0  ;;  %s882_s21 = smov (!%p31_p0, %s33_s21), %s768_s18 }
   0x7   : > { %p226_p3 = pnand %p639_p1, %p225_p2  ;;  %p35_p4 = scmp.ge.s32.totalorder %s882_s21, 2 }
   0x8   : > { %p279_p5 = scmp.lt.s32.totalorder (!%p226_p3), %s760_s16, 1  ;;  %p287_p6 = scmp.lt.s32.totalorder (!%p226_p3), %s756_s15, 1  ;;  %v774_v0 = vmov (!%p226_p3), 0   ;;  %vm363_vm0 = vcmask (!%p226_p3), 261120   ;;  %vm444_vm1 = vcmask (!%p226_p3), 1040384   ;;  %vm454_vm2 = vcmask (!%p226_p3), 1046528  }
   0x9   : > { %s884_s21 = smov (%p35_p4, %s882_s21), 0  ;;  %229 = sbr.rel (%p226_p3) target bundleno = 279 (0x117), region = 36 }
   0xa   : > { %716 = vset.pattern.permute.xlu0 (!%p226_p3), %v774_v0  ;;  %717 = vset.pattern.permute.xlu1 (!%p226_p3), %v774_v0  ;;  %vm464_vm3 = vcmask (!%p226_p3), 57344   ;;  %vm462_vm4 = vcmask (!%p226_p3), 64512  }
  0x10   : > { %s886_s16 = smov (!%p279_p5, %s760_s16), 1  ;;  %s888_s15 = smov (!%p287_p6, %s756_s15), 1 }
  0x11   : > { %s657_s22 = sshll.u32 %s886_s16, 4  ;;  %s674_s26 = smul.u32 6, %s886_s16 }
  0x12   : > { %s286_s25 = scalar_lea.vmem %s870_s0, %s657_s22  ;;  %s670_s27 = smul.u32 12, %s888_s15 }
  0x13   : > { %v718_v1 = vld [vmem:[%s286_s25] sm:$0xff]   ;;  %s673_s28 = smul.u32 3, %s888_s15  ;;  %v719_v2 = vld [vmem:[%s286_s25 + $0x8] sm:$0xff]  }
  0x14   : > { %662 = vmatprep.subr.bf16.mxu0 %v718_v1  ;;  %s291_s5 = scalar_lea.vmem %s871_s1, %s670_s27  ;;  %s671_s7 = smul.u32 24, %s888_s15 }
  0x15   : > { %663 = vmatpush3.bf16.msra.mxu0 %v718_v1  ;;  %s840_s6 = sadd.s32 %s674_s26, %s673_s28  ;;  %v720_v3 = vld [vmem:[%s291_s5] sm:$0xff]   ;;  %v721_v4 = vld [vmem:[%s291_s5 + $0x8] ss:$0 sps:$4 sm:$0x11]   ;;  %s672_s11 = smul.u32 24, %s886_s16 }
  0x16   : > { %664 = vmatprep.subr.bf16.mxu0 %v719_v2  ;;  %s296_s10 = scalar_lea.vmem %s872_s2, %s671_s7  ;;  %666 = vmatprep.mubr.msk.bf16.mxu0 %vm363_vm0, %v720_v3  ;;  %s645_s15 = sshll.u32 %s840_s6, 3 }
  0x17   : > { %v326_v5 = vld [vmem:[%s296_s10 + $0x8] sm:$0xff]  ;;  %v325_v6 = vld [vmem:[%s296_s10] sm:$0xff]  ;;  %v327_v7 = vld [vmem:[%s296_s10 + $0x10] sm:$0x3]  ;;  %s304_s14 = scalar_lea.vmem %s873_s3, %s672_s11  ;;  %s316_s23 = scalar_lea.vmem %s874_s4, %s645_s15 }
  0x18   : > { %335 = vperm.xlu0 %716, %v326_v5   ;;  %330 = vperm.xlu1 %717, %v325_v6   ;;  %v436_v26 = vld [vmem:[%s304_s14] sm:$0xff]  ;;  %v437_v27 = vld [vmem:[%s304_s14 + $0x8] sm:$0x1]  ;;  %v438_v28 = vld [vmem:[%s304_s14 + $0x9] sm:$0xff] }
  0x19   : > { %665 = vmatpush3.bf16.msra.mxu0 %v719_v2  ;;  %v439_v29 = vld [vmem:[%s304_s14 + $0x11] sm:$0x1]  ;;  %v445_v31 = vrot.slane %v438_v28, 7  ;;  %v470_v33 = vrot.slane %v436_v26, 7  ;;  %v471_v34 = vrot.slane %v437_v27, 7 }
  0x1a   : > { %v446_v32 = vrot.slane %v439_v29, 7 }
  0x1b   : > { %v472_v36 = vsel %vm444_vm1, %v470_v33, %v471_v34 }
  0x1c   : > { %667 = vmatmul.mubr.msk.bf16.vlgmr.msra.gmra.mrb[0].mxu0 %vm363_vm0, %v721_v4  ;;  %340 = vperm.xlu0 %716, %v327_v7   ;;  %v447_v35 = vsel %vm444_vm1, %v445_v31, %v446_v32 }
  0x97   : > { %v336_v8 = vpop.permute.xlu0 %335  ;;  %v331_v10 = vpop.permute.xlu1 %330 }
  0x9b   : > { %v341_v9 = vpop.permute.xlu0 %340 }
  0xef   : > { %v668_v11 = vpop.f32.mrb[0].mxu0 }
  0xf0   : > { %v413_v12 = vadd.f32 %v668_v11, %v341_v9  ;;  %v404_v13 = vpop.f32.mrb[1].mxu0 }
  0xf1   : > { %v405_v14 = vadd.f32 %v404_v13, %v331_v10  ;;  %v669_v15 = vpop.f32.mrb[2].mxu0 }
  0xf2   : > { %v654_v16 = vmul.f32 -1.442695, %v413_v12  ;;  %v407_v17 = vpop.f32.mrb[3].mxu0 }
  0xf3   : > { %v652_v18 = vmul.f32 -1.442695, %v405_v14  ;;  %v408_v19 = vadd.f32 %v407_v17, %v336_v8 }
  0xf4   : > { %722 = vpow2.f32 %v654_v16 }
  0xf5   : > { %724 = vpow2.f32 %v652_v18  ;;  %v653_v20 = vmul.f32 -1.442695, %v408_v19 }
  0xf7   : > { %726 = vpow2.f32 %v653_v20 }
  0xfe   : > { %v723_v21 = vpop.eup %722 }
  0xff   : > { %v725_v22 = vpop.eup %724  ;;  %v429_v23 = vadd.f32 1.0, %v723_v21 }
 0x100   : > { %v427_v24 = vadd.f32 1.0, %v725_v22 }
 0x101   : > { %v727_v25 = vpop.eup %726  ;;  %728 = vrcp.f32 %v429_v23 }
 0x102   : > { %730 = vrcp.f32 %v427_v24  ;;  %v428_v30 = vadd.f32 1.0, %v727_v25 }
 0x104   : > { %732 = vrcp.f32 %v428_v30 }
 0x10b   : > { %v729_v37 = vpop.eup %728 }
 0x10c   : > { %v731_v38 = vpop.eup %730  ;;  %v451_v39 = vmul.f32 %v729_v37, %v447_v35  ;;  %v476_v40 = vmul.f32 %v729_v37, %v472_v36 }
 0x10d   : > { %v440_v41 = vmul.f32 %v731_v38, %v436_v26  ;;  %v466_v42 = vmul.f32 %v731_v38, %v438_v28 }
 0x10e   : > { %v733_v43 = vpop.eup %732  ;;  %v456_v44 = vrot.slane %v451_v39, 1  ;;  %v480_v45 = vrot.slane %v476_v40, 1 }
 0x10f   : > { %v441_v46 = vmul.f32 %v733_v43, %v437_v27  ;;  %v450_v47 = vmul.f32 %v733_v43, %v445_v31  ;;  %v467_v48 = vmul.f32 %v733_v43, %v439_v29  ;;  %v475_v49 = vmul.f32 %v733_v43, %v470_v33 }
 0x111   : > { %v455_v50 = vrot.slane %v450_v47, 1  ;;  %v461_v51 = vsub.f32 %v441_v46, %v456_v44  ;;  %v479_v52 = vrot.slane %v475_v49, 1  ;;  %v485_v53 = vadd.f32 %v480_v45, %v467_v48 }
 0x113   : > { %v457_v54 = vsel %vm454_vm2, %v455_v50, %v456_v44  ;;  %465 = vst.msk [vmem:[%s316_s23 + $0x8] sm:$0x1] %vm464_vm3, %v461_v51  ;;  %v481_v55 = vsel %vm454_vm2, %v479_v52, %v480_v45  ;;  %487 = vst.msk [vmem:[%s316_s23 + $0x11] sm:$0x1] %vm464_vm3, %v485_v53 }
 0x114   : > { %v460_v56 = vsub.f32 %v440_v41, %v457_v54  ;;  %v484_v57 = vadd.f32 %v481_v55, %v466_v42 }
 0x116   : > { %463 = vst.msk [vmem:[%s316_s23] sm:$0xff] %vm462_vm4, %v460_v56  ;;  %486 = vst.msk [vmem:[%s316_s23 + $0x9] sm:$0xff] %vm462_vm4, %v484_v57 }
 0x117 PF: > { %s14_s19 = sadd.s32 1, %s772_s19   ;;  %s875_s15 = smov %s764_s17 }
 0x118   : > { %p11_p7 = scmp.ge.s32.totalorder %s14_s19, 6   ;;  %s876_s16 = smov %s768_s18 }
 0x119   : > { %s877_s17 = smov %s880_s20  ;;  %s878_s18 = smov %s884_s21 }
 0x11a   :  { %13 = sbr.rel (!%p11_p7) target bundleno = 3 (0x3), region = 75 }

</bundles_post_ra>
